<compile_context>
chip_gen: v6e
topology: v6e:2x2x1
jax: 0.10.0
libtpu: 0.0.40
codegen_flags: <defaults>
</compile_context>

<pallas_src>
import math

import jax
import jax.numpy as jnp
from jax.experimental import pallas as pl
from jax.experimental.pallas import tpu as pltpu

GAMMA = 1.5   # matches FocalLoss(gamma=1.5); implemented exactly as q * sqrt(q)
SLAB = 8      # rows per inner-loop slab == one 8-sublane vreg group per lane tile


def _ceil_to(x, m):
    return ((x + m - 1) // m) * m


def _make_kernel(block_rows, lanes, rows_valid, needs_mask):
    """Builds the kernel with static tiling constants closed over."""
    num_slabs = block_rows // SLAB

    def kernel(pred_ref, label_ref, wmask_ref, out_ref):
        blk_row0 = pl.program_id(0) * block_rows
        if needs_mask:
            # Hoisted once (JAX does not CSE broadcast_in_dim inside loops).
            row_iota = jax.lax.broadcasted_iota(jnp.int32, (SLAB, lanes), 0)

        def body(s, acc):
            r0 = pl.multiple_of(s * SLAB, SLAB)
            x = pred_ref[pl.ds(r0, SLAB), :].astype(jnp.float32)
            y = label_ref[pl.ds(r0, SLAB), :].astype(jnp.float32)
            w = wmask_ref[pl.ds(r0, SLAB), :].astype(jnp.float32)

            # nn.BCEWithLogitsLoss(reduce=False), numerically stable form:
            #   bce = max(x, 0) - x*y + log(1 + exp(-|x|))   (always >= 0)
            bce = jnp.maximum(x, 0.0) - x * y + jnp.log1p(jnp.exp(-jnp.abs(x)))
            pt = jnp.exp(-bce)
            # Intentional deviation from torch: clamp so a pt rounding above 1
            # cannot NaN the fractional power.
            q = jnp.maximum(1.0 - pt, 0.0)
            # (1 - pt)^1.5 * BCE (gamma = 1.5) as q*sqrt(q) -> no exp/log pow.
            weighted = q * jnp.sqrt(q) * bce * w
            # TODO(synk): optional v7x EUP relief for hard {0,1} labels:
            #   pt = where(x*(2y-1) >= 0, 1, exp(-|x|)) * reciprocal(1+exp(-|x|))
            # trades one vexp for a vrcp; not applied to keep exact semantics
            # for arbitrary label values.

            if needs_mask:
                # The last grid block may extend past the valid rows; data read
                # there is unspecified, so zero its contribution.
                grow = blk_row0 + r0 + row_iota
                weighted = jnp.where(grow < rows_valid, weighted, 0.0)
            return acc + weighted

        out_ref[...] = jax.lax.fori_loop(
            0, num_slabs, body, jnp.zeros((SLAB, lanes), jnp.float32))

    return kernel


def focal_loss(pred, label, weight_mask, *,
               lanes=512, max_block_rows=2048,
               vmem_limit_bytes=48 * 1024 * 1024):
    """Pallas equivalent of FocalLoss(gamma=1.5).forward(pred, label, weight_mask).

    Shape-agnostic: inputs of any (identical) shape are flattened, minimally
    zero-padded (padded weight_mask entries are 0 so they contribute nothing)
    and reshaped to (M, lanes). The mean divides by the ORIGINAL element count.
    """
    assert pred.shape == label.shape == weight_mask.shape
    assert lanes % 128 == 0, "lanes must be a multiple of 128"
    assert max_block_rows % SLAB == 0, "max_block_rows must be a multiple of 8"

    n_elems = int(math.prod(pred.shape))
    assert n_elems > 0

    # Minimal padding: only to the next multiple of one (8, lanes) row group,
    # never to a multiple of the block size.
    chunk = SLAB * lanes
    padded = _ceil_to(n_elems, chunk)
    M = padded // lanes                      # total rows, multiple of 8

    # Block rows: as large as possible (amortize ~0.35us/grid-step overhead),
    # but guarantee >= 2 grid blocks for medium inputs so both v7x TensorCores
    # get work via the "parallel" grid axis.
    if M > 2 * SLAB:
        block_rows = min(max_block_rows, _ceil_to(pl.cdiv(M, 2), SLAB))
    else:
        block_rows = min(max_block_rows, M)
    num_blocks = pl.cdiv(M, block_rows)
    needs_mask = (M % block_rows) != 0       # last block is partial

    def prep(a):
        flat = jnp.reshape(a, (-1,))
        if padded != n_elems:                # skip the HBM copy when aligned
            flat = jnp.pad(flat, (0, padded - n_elems))   # pads with 0
        return flat.reshape(M, lanes)

    p2 = prep(pred)
    l2 = prep(label)
    w2 = prep(weight_mask)   # padded weights are 0 -> no bias in the sum

    tile = pl.BlockSpec((block_rows, lanes), lambda i: (i, 0))
    kernel = _make_kernel(block_rows, lanes, M, needs_mask)

    in_bytes = padded * (p2.dtype.itemsize + l2.dtype.itemsize + w2.dtype.itemsize)
    cost = pl.CostEstimate(
        flops=12 * padded,
        transcendentals=4 * padded,                       # exp, log1p, exp, sqrt
        bytes_accessed=in_bytes + 4 * num_blocks * SLAB * lanes,
    )

    partials = pl.pallas_call(
        kernel,
        out_shape=jax.ShapeDtypeStruct((num_blocks * SLAB, lanes), jnp.float32),
        grid_spec=pltpu.PrefetchScalarGridSpec(
            num_scalar_prefetch=0,
            grid=(num_blocks,),
            in_specs=[tile, tile, tile],
            # Each grid step owns a disjoint (8, lanes) output tile -> the grid
            # axis is truly parallel (shardable across v7x's 2 TensorCores).
            out_specs=pl.BlockSpec((SLAB, lanes), lambda i: (i, 0)),
        ),
        compiler_params=pltpu.CompilerParams(
            dimension_semantics=("parallel",),
            vmem_limit_bytes=vmem_limit_bytes,
        ),
        cost_estimate=cost,
    )(p2, l2, w2)

    # Tiny final reduction + mean over the ORIGINAL (unpadded) element count.
    return jnp.sum(partials) / n_elems


def focal_loss_ref(pred, label, weight_mask):
    """Pure-JAX reference mirroring the PyTorch forward."""
    x = pred.astype(jnp.float32)
    y = label.astype(jnp.float32)
    w = weight_mask.astype(jnp.float32)
    bce = jnp.maximum(x, 0.0) - x * y + jnp.log1p(jnp.exp(-jnp.abs(x)))
    pt = jnp.exp(-bce)
    f = (1.0 - pt) ** GAMMA * bce
    return jnp.mean(f * w)


if __name__ == "__main__":
    def run_case(shape, seed):
        k1, k2, k3 = jax.random.split(jax.random.PRNGKey(seed), 3)
        pred = jax.random.normal(k1, shape, dtype=jnp.float32)
        label = jax.random.bernoulli(k2, 0.5, shape).astype(jnp.float32)
        weight_mask = jax.random.uniform(k3, shape, dtype=jnp.float32)

        loss = jax.block_until_ready(focal_loss(pred, label, weight_mask))
        ref = focal_loss_ref(pred, label, weight_mask)
        assert jnp.allclose(loss, ref, rtol=1e-5, atol=1e-6), (shape, loss, ref)

    # Small shape consistent with the module: (batch=2, seq=8, classes=64).
    run_case((2, 8, 64), 0)
    # Unaligned shape exercising minimal padding + the in-kernel tail mask
    # (9000 elems -> 24 rows x 512 lanes -> 2 blocks of 16 rows, last partial).
    run_case((2, 9, 500), 1)

    print("KERNEL_OK")
</pallas_src>

<mosaic_0001>
module attributes {stable_mosaic.version = 11 : i64} {
  func.func @kernel(%arg0: i32, %arg1: memref<8x512xf32, #tpu.memory_space<vmem>>, %arg2: memref<8x512xf32, #tpu.memory_space<vmem>>, %arg3: memref<8x512xf32, #tpu.memory_space<vmem>>, %arg4: memref<8x512xf32, #tpu.memory_space<vmem>>) attributes {dimension_semantics = [#tpu.dimension_semantics<parallel>], iteration_bounds = array<i64: 1>, scalar_prefetch = 0 : i64, scratch_operands = 0 : i64, tpu.core_type = #tpu.core_type<tc>, window_params = [{transform_indices = @transform_0, window_bounds = array<i64: 8, 512>}, {transform_indices = @transform_1, window_bounds = array<i64: 8, 512>}, {transform_indices = @transform_2, window_bounds = array<i64: 8, 512>}, {transform_indices = @transform_3, window_bounds = array<i64: 8, 512>}]} {
    %cst = arith.constant 0.000000e+00 : f32
    %0 = vector.broadcast %cst : f32 to vector<8x512xf32>
    %c0_i32 = arith.constant 0 : i32
    %c8_i32 = arith.constant 8 : i32
    %1 = arith.muli %c0_i32, %c8_i32 : i32
    %2 = tpu.assume_multiple %1, 8 : i32
    %3 = arith.index_cast %2 : i32 to index
    %c0 = arith.constant 0 : index
    %4 = vector.load %arg1[%3, %c0] : memref<8x512xf32, #tpu.memory_space<vmem>>, vector<8x512xf32>
    %5 = arith.index_cast %2 : i32 to index
    %c0_0 = arith.constant 0 : index
    %6 = vector.load %arg2[%5, %c0_0] : memref<8x512xf32, #tpu.memory_space<vmem>>, vector<8x512xf32>
    %7 = arith.index_cast %2 : i32 to index
    %c0_1 = arith.constant 0 : index
    %8 = vector.load %arg3[%7, %c0_1] : memref<8x512xf32, #tpu.memory_space<vmem>>, vector<8x512xf32>
    %cst_2 = arith.constant 0.000000e+00 : f32
    %9 = vector.broadcast %cst_2 : f32 to vector<8x512xf32>
    %10 = arith.maximumf %4, %9 : vector<8x512xf32>
    %11 = arith.mulf %4, %6 : vector<8x512xf32>
    %12 = arith.subf %10, %11 : vector<8x512xf32>
    %13 = math.absf %4 : vector<8x512xf32>
    %cst_3 = arith.constant 0.000000e+00 : f32
    %14 = vector.broadcast %cst_3 : f32 to vector<8x512xf32>
    %15 = arith.subf %14, %13 : vector<8x512xf32>
    %16 = math.exp %15 : vector<8x512xf32>
    %17 = math.log1p %16 : vector<8x512xf32>
    %18 = arith.addf %12, %17 : vector<8x512xf32>
    %cst_4 = arith.constant 0.000000e+00 : f32
    %19 = vector.broadcast %cst_4 : f32 to vector<8x512xf32>
    %20 = arith.subf %19, %18 : vector<8x512xf32>
    %21 = math.exp %20 : vector<8x512xf32>
    %cst_5 = arith.constant 1.000000e+00 : f32
    %22 = vector.broadcast %cst_5 : f32 to vector<8x512xf32>
    %23 = arith.subf %22, %21 : vector<8x512xf32>
    %cst_6 = arith.constant 0.000000e+00 : f32
    %24 = vector.broadcast %cst_6 : f32 to vector<8x512xf32>
    %25 = arith.maximumf %23, %24 : vector<8x512xf32>
    %26 = math.sqrt %25 : vector<8x512xf32>
    %27 = arith.mulf %25, %26 : vector<8x512xf32>
    %28 = arith.mulf %27, %18 : vector<8x512xf32>
    %29 = arith.mulf %28, %8 : vector<8x512xf32>
    %30 = arith.addf %0, %29 : vector<8x512xf32>
    %c1_i32 = arith.constant 1 : i32
    %c0_7 = arith.constant 0 : index
    %c0_8 = arith.constant 0 : index
    %31 = vector.load %arg4[%c0_7, %c0_8] : memref<8x512xf32, #tpu.memory_space<vmem>>, vector<8x512xf32>
    tpu.vector_store %arg4[%c0_7, %c0_8], %30 {strides = array<i32>} : memref<8x512xf32, #tpu.memory_space<vmem>>, vector<8x512xf32>,
    return
  }
  func.func @transform_0(%arg0: i32) -> (i32, i32) {
    %c0_i32 = arith.constant 0 : i32
    %c0_i32_0 = arith.constant 0 : i32
    return %arg0, %c0_i32 : i32, i32
  }
  func.func @transform_1(%arg0: i32) -> (i32, i32) {
    %c0_i32 = arith.constant 0 : i32
    %c0_i32_0 = arith.constant 0 : i32
    return %arg0, %c0_i32 : i32, i32
  }
  func.func @transform_2(%arg0: i32) -> (i32, i32) {
    %c0_i32 = arith.constant 0 : i32
    %c0_i32_0 = arith.constant 0 : i32
    return %arg0, %c0_i32 : i32, i32
  }
  func.func @transform_3(%arg0: i32) -> (i32, i32) {
    %c0_i32 = arith.constant 0 : i32
    %c0_i32_0 = arith.constant 0 : i32
    return %arg0, %c0_i32 : i32, i32
  }
}

</mosaic_0001>

<bundles_post_ra>
// kernel: tpu_custom_call.1
= control target key start
LH: loop header
LB: loop body
LE: loop exit
PB: predicated region body
PF: predicated region fallthrough
CT: control target
= control target key end

     0   :  { %8 = vsyncpa [#allocation3], 0  ;;  %s403_s0 = inlined_call_operand.hbm [shape: f32[8,512], index: 0, kind: input, shape index: {}]   ;;  %s404_s1 = inlined_call_operand.hbm [shape: f32[8,512], index: 1, kind: input, shape index: {}]   ;;  %s405_s2 = inlined_call_operand.hbm [shape: f32[8,512], index: 2, kind: input, shape index: {}]   ;;  %s406_s3 = inlined_call_operand.hbm [shape: f32[8,512], index: 3, kind: output, shape index: {}]  }
   0x1   :  { %9 = vsyncpa [#allocation6], 0 }
   0x2   :  { %10 = vsyncpa [#allocation4], 0  ;;  %s343_s12 = smov [#allocation5]   ;;  %s344_s14 = smov [#allocation2]  }
   0x3   :  { %s27_s13 = sshll.u32 %s343_s12, 4  ;;  %s17_s15 = sshll.u32 %s344_s14, 4  ;;  %s28_s13 = int_to_ptr.vmem [resolvable:$true] %s27_s13  ;;  %s18_s15 = int_to_ptr.vmem [resolvable:$true] %s17_s15 }
   0x4   :  { %s265_s16 = scalar_lea.vmem %s28_s13, 512  ;;  %p270_p1 = scmp.lt.s32.totalorder %s28_s13, %s28_s13 }
   0x5   :  { %p266_p0 = scmp.ne.s32.totalorder %s28_s13, %s265_s16  ;;  %p271_p2 = scmp.lt.s32.totalorder %s265_s16, %s265_s16 }
   0x7   :  { %p272_p3 = por %p271_p2, %p270_p1 }
   0x9   :  { %p273_p4 = pnand %p272_p3, %p266_p0 }
   0xb   :  { %276 = shalt.err (!%p273_p4)
}
   0xc   :  { %30 = dma.hbm_to_vmem [thread:$0]  %s404_s1, 512, %s28_s13, [#allocation6]  }
   0xd   :  { %s285_s19 = scalar_lea.vmem %s18_s15, 512  ;;  %p290_p6 = scmp.lt.s32.totalorder %s18_s15, %s18_s15 }
   0xe   :  { %p286_p5 = scmp.ne.s32.totalorder %s18_s15, %s285_s19  ;;  %p291_p7 = scmp.lt.s32.totalorder %s285_s19, %s285_s19 }
  0x10   :  { %p292_p8 = por %p291_p7, %p290_p6 }
  0x12   :  { %p293_p9 = pnand %p292_p8, %p286_p5 }
  0x14   :  { %296 = shalt.err (!%p293_p9)
}
  0x15   :  { %20 = dma.hbm_to_vmem [thread:$0]  %s403_s0, 512, %s18_s15, [#allocation3]  }
  0x16   :  { %s345_s22 = smov [#allocation7]  }
  0x17   :  { %s37_s23 = sshll.u32 %s345_s22, 4  ;;  %s38_s23 = int_to_ptr.vmem [resolvable:$true] %s37_s23 }
  0x18   :  { %s305_s24 = scalar_lea.vmem %s38_s23, 512  ;;  %p310_p11 = scmp.lt.s32.totalorder %s38_s23, %s38_s23 }
  0x19   :  { %p306_p10 = scmp.ne.s32.totalorder %s38_s23, %s305_s24  ;;  %p311_p12 = scmp.lt.s32.totalorder %s305_s24, %s305_s24 }
  0x1b   :  { %p312_p13 = por %p311_p12, %p310_p11 }
  0x1d   :  { %p313_p0 = pnand %p312_p13, %p306_p10 }
  0x1f   :  { %316 = shalt.err (!%p313_p0)
}
  0x20   :  { %40 = dma.hbm_to_vmem [thread:$0]  %s405_s2, 512, %s38_s23, [#allocation6]  }
  0x21   :  { %337 = dma.done.wait [#allocation3], 512  }
  0x22   :  { %338 = vsyncadd [#allocation3], 4294966784 }
  0x23   :  { %339 = dma.done.wait [#allocation6], 1024  }
  0x24   :  { %340 = vsyncadd [#allocation6], 4294966272  ;;  %v53_v0 = vld [vmem:[#allocation2] sm:$0xff]  ;;  %v54_v2 = vld [vmem:[#allocation2 + $0x8] sm:$0xff]  ;;  %s346_s0 = smov [#allocation8]  }
  0x25   :  { %v81_v1 = vand.u32 2147483647, %v53_v0  ;;  %v82_v3 = vand.u32 2147483647, %v54_v2  ;;  %v376_v4 = vld [vmem:[#allocation2 + $0x10] sm:$0xff]  ;;  %v378_v6 = vld [vmem:[#allocation2 + $0x18] sm:$0xff] }
  0x26   :  { %v83_v8 = vand.u32 2147483647, %v376_v4  ;;  %v84_v10 = vand.u32 2147483647, %v378_v6  ;;  %v59_v26 = vld [vmem:[#allocation5] sm:$0xff]  ;;  %v60_v27 = vld [vmem:[#allocation5 + $0x8] sm:$0xff] }
  0x27   :  { %v85_v5 = vsub.f32 0.0, %v81_v1  ;;  %v86_v7 = vsub.f32 0.0, %v82_v3  ;;  %v61_v30 = vld [vmem:[#allocation5 + $0x10] sm:$0xff]  ;;  %v69_v32 = vmax.f32 %v53_v0, 0.0  ;;  %v73_v33 = vmul.f32 %v59_v26, %v53_v0  ;;  %v62_v36 = vld [vmem:[#allocation5 + $0x18] sm:$0xff]  ;;  %s211_s2 = sshll.u32 %s346_s0, 4  ;;  %s212_s2 = int_to_ptr.vmem [resolvable:$true] %s211_s2 }
  0x28   :  { %v87_v12 = vsub.f32 0.0, %v83_v8  ;;  %v88_v13 = vsub.f32 0.0, %v84_v10  ;;  %v70_v37 = vmax.f32 %v54_v2, 0.0  ;;  %v74_v38 = vmul.f32 %v60_v27, %v54_v2  ;;  %s317_s26 = scalar_lea.vmem %s212_s2, 512  ;;  %p322_p2 = scmp.lt.s32.totalorder %s212_s2, %s212_s2 }
  0x29   :  { %v89_v9 = vmul.f32 1.442695, %v85_v5  ;;  %v91_v11 = vmul.f32 1.442695, %v86_v7  ;;  %v71_v40 = vmax.f32 %v376_v4, 0.0  ;;  %v75_v41 = vmul.f32 %v61_v30, %v376_v4  ;;  %p318_p1 = scmp.ne.s32.totalorder %s212_s2, %s317_s26  ;;  %p323_p3 = scmp.lt.s32.totalorder %s317_s26, %s317_s26 }
  0x2a   :  { %v93_v14 = vmul.f32 1.442695, %v87_v12  ;;  %v95_v15 = vmul.f32 1.442695, %v88_v13  ;;  %v72_v43 = vmax.f32 %v378_v6, 0.0  ;;  %v76_v46 = vmul.f32 %v62_v36, %v378_v6 }
  0x2b   :  { %225 = vpow2.f32 %v89_v9  ;;  %v77_v49 = vsub.f32 %v69_v32, %v73_v33  ;;  %v78_v55 = vsub.f32 %v70_v37, %v74_v38  ;;  %v79_v57 = vsub.f32 %v71_v40, %v75_v41  ;;  %p324_p4 = por %p323_p3, %p322_p2 }
  0x2c   :  { %227 = vpow2.f32 %v91_v11  ;;  %v80_v61 = vsub.f32 %v72_v43, %v76_v46  ;;  %v65_v43 = vld [vmem:[#allocation7] sm:$0xff] }
  0x2d   :  { %229 = vpow2.f32 %v93_v14  ;;  %p325_p5 = pnand %p324_p4, %p318_p1 }
  0x2e   :  { %231 = vpow2.f32 %v95_v15 }
  0x38   :  { %v226_v16 = vpop.eup %225 }
  0x39   :  { %v228_v17 = vpop.eup %227  ;;  %v97_v18 = vadd.f32 1.0, %v226_v16  ;;  %v100_v24 = vmul.f32 -0.5, %v226_v16  ;;  %v103_v34 = vand.u32 2147483647, %v226_v16 }
  0x3a   :  { %v106_v19 = vadd.f32 1.0, %v228_v17  ;;  %v230_v20 = vpop.eup %229  ;;  %v109_v25 = vmul.f32 -0.5, %v228_v17  ;;  %v112_v39 = vand.u32 2147483647, %v228_v17 }
  0x3b   :  { %233 = vlog2.f32 %v97_v18  ;;  %v232_v21 = vpop.eup %231  ;;  %v115_v22 = vadd.f32 1.0, %v230_v20  ;;  %v118_v28 = vmul.f32 -0.5, %v230_v20  ;;  %v101_v29 = vadd.f32 1.0, %v100_v24 }
  0x3c   :  { %235 = vlog2.f32 %v106_v19  ;;  %v124_v23 = vadd.f32 1.0, %v232_v21  ;;  %v127_v31 = vmul.f32 -0.5, %v232_v21  ;;  %v110_v35 = vadd.f32 1.0, %v109_v25 }
  0x3d   :  { %237 = vlog2.f32 %v115_v22  ;;  %v119_v42 = vadd.f32 1.0, %v118_v28  ;;  %v102_v44 = vmul.f32 %v226_v16, %v101_v29  ;;  %v121_v45 = vand.u32 2147483647, %v230_v20 }
  0x3e   :  { %239 = vlog2.f32 %v124_v23  ;;  %v128_v47 = vadd.f32 1.0, %v127_v31  ;;  %vm386_vm0 = vcmp.lt.f32.partialorder %v103_v34, 0.0004427343  ;;  %v111_v51 = vmul.f32 %v228_v17, %v110_v35 }
  0x3f   :  { %v130_v52 = vand.u32 2147483647, %v232_v21  ;;  %vm113_vm1 = vcmp.lt.f32.partialorder %v112_v39, 0.0004427343  ;;  %v120_v58 = vmul.f32 %v230_v20, %v119_v42  ;;  %vm122_vm2 = vcmp.lt.f32.partialorder %v121_v45, 0.0004427343 }
  0x40   :  { %v129_v62 = vmul.f32 %v232_v21, %v128_v47  ;;  %v66_v47 = vld [vmem:[#allocation7 + $0x8] sm:$0xff] }
  0x41   :  { %vm131_vm3 = vcmp.lt.f32.partialorder %v130_v52, 0.0004427343 }
  0x48   :  { %v234_v48 = vpop.eup %233 }
  0x49   :  { %v236_v53 = vpop.eup %235  ;;  %v99_v54 = vmul.f32 0.6931472, %v234_v48 }
  0x4a   :  { %v108_v56 = vmul.f32 0.6931472, %v236_v53  ;;  %v238_v59 = vpop.eup %237 }
  0x4b   :  { %v105_v60 = vsel %vm386_vm0, %v102_v44, %v99_v54  ;;  %v240_v63 = vpop.eup %239  ;;  %v117_v2 = vmul.f32 0.6931472, %v238_v59 }
  0x4c   :  { %v133_v0 = vadd.f32 %v105_v60, %v77_v49  ;;  %v114_v1 = vsel %vm113_vm1, %v111_v51, %v108_v56  ;;  %v126_v4 = vmul.f32 0.6931472, %v240_v63  ;;  %v67_v56 = vld [vmem:[#allocation7 + $0x10] sm:$0xff] }
  0x4d   :  { %v134_v3 = vadd.f32 %v114_v1, %v78_v55  ;;  %v123_v6 = vsel %vm122_vm2, %v120_v58, %v117_v2 }
  0x4e   :  { %v137_v5 = vsub.f32 0.0, %v133_v0  ;;  %v392_v8 = vadd.f32 %v123_v6, %v79_v57  ;;  %v132_v9 = vsel %vm131_vm3, %v129_v62, %v126_v4  ;;  %v68_v62 = vld [vmem:[#allocation7 + $0x18] sm:$0xff] }
  0x4f   :  { %v138_v7 = vsub.f32 0.0, %v134_v3  ;;  %v394_v11 = vadd.f32 %v132_v9, %v80_v61 }
  0x50   :  { %v141_v10 = vmul.f32 1.442695, %v137_v5  ;;  %v139_v13 = vsub.f32 0.0, %v392_v8 }
  0x51   :  { %v143_v12 = vmul.f32 1.442695, %v138_v7  ;;  %v140_v14 = vsub.f32 0.0, %v394_v11 }
  0x52   :  { %241 = vpow2.f32 %v141_v10  ;;  %v145_v15 = vmul.f32 1.442695, %v139_v13 }
  0x53   :  { %243 = vpow2.f32 %v143_v12  ;;  %v147_v16 = vmul.f32 1.442695, %v140_v14 }
  0x54   :  { %245 = vpow2.f32 %v145_v15 }
  0x55   :  { %247 = vpow2.f32 %v147_v16 }
  0x5f   :  { %v242_v17 = vpop.eup %241 }
  0x60   :  { %v244_v18 = vpop.eup %243  ;;  %v149_v19 = vsub.f32 1.0, %v242_v17 }
  0x61   :  { %v150_v20 = vsub.f32 1.0, %v244_v18  ;;  %v246_v21 = vpop.eup %245 }
  0x62   :  { %v153_v22 = vmax.f32 %v149_v19, 0.0  ;;  %v248_v23 = vpop.eup %247  ;;  %v151_v25 = vsub.f32 1.0, %v246_v21 }
  0x63   :  { %v154_v24 = vmax.f32 %v150_v20, 0.0  ;;  %v152_v27 = vsub.f32 1.0, %v248_v23 }
  0x64   :  { %249 = vrsqrt.f32 %v153_v22  ;;  %v155_v26 = vmax.f32 %v151_v25, 0.0  ;;  %vm159_vm4 = vcmp.eq.f32.partialorder %v153_v22, inf  ;;  %v162_v30 = vand.u32 2147483648, %v153_v22 }
  0x65   :  { %251 = vrsqrt.f32 %v154_v24  ;;  %v156_v28 = vmax.f32 %v152_v27, 0.0  ;;  %vm161_vm5 = vcmp.eq.f32.partialorder %v153_v22, 0.0  ;;  %vm166_vm6 = vcmp.eq.f32.partialorder %v154_v24, inf }
  0x66   :  { %253 = vrsqrt.f32 %v155_v26  ;;  %v169_v33 = vand.u32 2147483648, %v154_v24  ;;  %vm168_vm7 = vcmp.eq.f32.partialorder %v154_v24, 0.0  ;;  %vm173_vm8 = vcmp.eq.f32.partialorder %v155_v26, inf }
  0x67   :  { %255 = vrsqrt.f32 %v156_v28  ;;  %v176_v39 = vand.u32 2147483648, %v155_v26  ;;  %vm175_vm9 = vcmp.eq.f32.partialorder %v155_v26, 0.0  ;;  %vm180_vm10 = vcmp.eq.f32.partialorder %v156_v28, inf }
  0x68   :  { %v183_v49 = vand.u32 2147483648, %v156_v28  ;;  %vm182_vm11 = vcmp.eq.f32.partialorder %v156_v28, 0.0 }
  0x71   :  { %v250_v29 = vpop.eup %249 }
  0x72   :  { %v252_v31 = vpop.eup %251  ;;  %v158_v32 = vmul.f32 %v250_v29, %v153_v22 }
  0x73   :  { %v165_v34 = vmul.f32 %v252_v31, %v154_v24  ;;  %v254_v36 = vpop.eup %253 }
  0x74   :  { %v160_v35 = vsel %vm159_vm4, %v153_v22, %v158_v32  ;;  %v172_v42 = vmul.f32 %v254_v36, %v155_v26  ;;  %v256_v45 = vpop.eup %255 }
  0x75   :  { %v163_v37 = vsel %vm161_vm5, %v162_v30, %v160_v35  ;;  %v167_v38 = vsel %vm166_vm6, %v154_v24, %v165_v34  ;;  %v179_v52 = vmul.f32 %v256_v45, %v156_v28 }
  0x76   :  { %v185_v40 = vmul.f32 %v163_v37, %v153_v22  ;;  %v170_v41 = vsel %vm168_vm7, %v169_v33, %v167_v38  ;;  %v174_v48 = vsel %vm173_vm8, %v155_v26, %v172_v42 }
  0x77   :  { %v186_v44 = vmul.f32 %v170_v41, %v154_v24  ;;  %v177_v51 = vsel %vm175_vm9, %v176_v39, %v174_v48  ;;  %v181_v57 = vsel %vm180_vm10, %v156_v28, %v179_v52 }
  0x78   :  { %v189_v46 = vmul.f32 %v185_v40, %v133_v0  ;;  %v187_v54 = vmul.f32 %v177_v51, %v155_v26  ;;  %v184_v59 = vsel %vm182_vm11, %v183_v49, %v181_v57 }
  0x79   :  { %v190_v50 = vmul.f32 %v186_v44, %v134_v3  ;;  %v188_v60 = vmul.f32 %v184_v59, %v156_v28 }
  0x7a   :  { %v193_v53 = vmul.f32 %v189_v46, %v65_v43  ;;  %v191_v58 = vmul.f32 %v187_v54, %v392_v8 }
  0x7b   :  { %v194_v55 = vmul.f32 %v190_v50, %v66_v47  ;;  %v192_v63 = vmul.f32 %v188_v60, %v394_v11 }
  0x7c   :  { %201 = vst [vmem:[#allocation8] sm:$0xff] %v193_v53  ;;  %v195_v61 = vmul.f32 %v191_v58, %v67_v56 }
  0x7d   :  { %202 = vst [vmem:[#allocation8 + $0x8] sm:$0xff] %v194_v55  ;;  %v196_v0 = vmul.f32 %v192_v63, %v68_v62 }
  0x7e   :  { %203 = vst [vmem:[#allocation8 + $0x10] sm:$0xff] %v195_v61 }
  0x7f   :  { %204 = vst [vmem:[#allocation8 + $0x18] sm:$0xff] %v196_v0 }
  0x80   :  { %328 = shalt.err (!%p325_p5)
}
  0x81   :  { %214 = dma.vmem_to_hbm [thread:$0]  %s212_s2, 512, %s406_s3, [#allocation4]  }
  0x82   :  { %341 = dma.done.wait [#allocation4], 512  }
  0x83   :  { %342 = vsyncadd [#allocation4], 4294966784 }
  0x84   :  { %218 = vsyncpa [#allocation3], 1 }
  0x85   :  { %219 = vsyncpa [#allocation6], 1 }
  0x86   :  { %220 = vsyncpa [#allocation4], 1 }

</bundles_post_ra>
